<compile_context>
chip_gen: v7x
topology: tpu7x:2x2x1
jax: 0.10.0
libtpu: 0.0.40
codegen_flags: <defaults>
</compile_context>

<pallas_src>
import functools

import jax
import jax.numpy as jnp
from jax import lax
from jax.experimental import pallas as pl
from jax.experimental.pallas import tpu as pltpu


def _round_up(x, m):
    return (x + m - 1) // m * m


# ----------------------------------------------------------------------------- kernel
def _bert_self_output_kernel(x_ref, res_ref, w_ref, b_ref, gamma_ref, beta_ref,
                             o_ref, *, eps: float, hidden: int):
    # Dense: x @ W^T  (MXU, f32 accumulation). K is un-tiled -> no accumulator.
    y = jnp.dot(x_ref[...], w_ref[...], preferred_element_type=jnp.float32)

    # TODO(synk): dropout is identity in eval mode; a training path would need
    # pltpu.prng_seed / pltpu.prng_random_bits masking behind an explicit flag.

    # + bias + residual (f32).
    h = y + b_ref[...].astype(jnp.float32) + res_ref[...].astype(jnp.float32)

    # One-pass LayerNorm statistics. Padded hidden columns of h are exactly zero
    # by construction (padded x cols, W^T rows/cols, bias and residual are all
    # zero), so dividing the Hp-wide sums by the true H gives the correct
    # mean/variance with no mask and no second reduction pass. Padded output
    # columns pick up garbage, but gamma/beta are zero there and the wrapper
    # slices them away.
    inv_h = 1.0 / float(hidden)
    mean = jnp.sum(h, axis=-1, keepdims=True) * inv_h
    ex2 = jnp.sum(h * h, axis=-1, keepdims=True) * inv_h
    var = ex2 - mean * mean
    inv_std = lax.rsqrt(var + eps)   # EUP

    out = (h - mean) * inv_std * gamma_ref[...].astype(jnp.float32) \
        + beta_ref[...].astype(jnp.float32)
    o_ref[...] = out.astype(o_ref.dtype)


# ----------------------------------------------------------------------------- params
def prepare_params(w, b, gamma, beta, *, param_dtype=None):
    """One-time parameter preparation (do this at load time, NOT per call).

    w: torch nn.Linear layout [H_out, H_in].  Returns (w_t, b2, gamma2, beta2)
    with the weight pre-transposed to [H_in, H_out], the hidden dim zero-padded
    to a multiple of 128 lanes, row-vectors reshaped to (1, Hp), and everything
    cast to `param_dtype` (pass jnp.bfloat16 in production to halve HBM/VMEM).
    """
    H = w.shape[0]
    Hp = _round_up(H, 128)
    w_t = jnp.asarray(w).T
    pad = Hp - H
    if pad:
        # Padded rows/cols/entries are zero so the in-kernel LN math stays exact.
        w_t = jnp.pad(w_t, ((0, pad), (0, pad)))
        b = jnp.pad(b, (0, pad))
        gamma = jnp.pad(gamma, (0, pad))
        beta = jnp.pad(beta, (0, pad))
    if param_dtype is not None:
        w_t = w_t.astype(param_dtype)
        b = b.astype(param_dtype)
        gamma = gamma.astype(param_dtype)
        beta = beta.astype(param_dtype)
    return w_t, b.reshape(1, Hp), gamma.reshape(1, Hp), beta.reshape(1, Hp)


# ----------------------------------------------------------------------------- tiling
def _choose_row_tile(rows, max_block_rows):
    """Largest tile <= max_block_rows; prefer MXU-aligned (256/128) multiples and
    prefer tiles that divide `rows` exactly so no wrapper-side row padding (extra
    HBM copies of both activation tensors) is ever needed."""
    for align in (256, 128, 8):
        tm = (min(max_block_rows, rows) // align) * align
        while tm >= align:
            if rows % tm == 0:
                return tm, rows
            tm -= align
    # Fallback: pad rows up to a multiple of a sublane-aligned tile.
    tm = _round_up(min(max_block_rows, _round_up(rows, 8)), 8)
    return tm, _round_up(rows, tm)


# ----------------------------------------------------------------------------- wrapper
def bert_self_output(hidden_state, input_tensor, w_t, b2, gamma2, beta2, eps,
                     *, block_rows=512):
    """Fused BertSelfOutput forward.

    hidden_state, input_tensor: [B, S, H]
    w_t, b2, gamma2, beta2: outputs of prepare_params() (pre-transposed / padded /
    cast ONCE at parameter-load time).  eps: python float (static).
    block_rows: requested row-tile size; automatically capped by a VMEM budget.
    """
    B, S, H = hidden_state.shape
    rows = B * S
    out_dtype = hidden_state.dtype

    Hp = w_t.shape[0]
    assert w_t.shape == (Hp, Hp) and Hp == _round_up(H, 128), "use prepare_params()"

    act_bytes = jnp.dtype(hidden_state.dtype).itemsize
    w_bytes = jnp.dtype(w_t.dtype).itemsize

    # VMEM budget: W^T (single-buffered) + 3 pipelined (tm,Hp) arrays x 2 buffers
    # + f32 LN temporaries.  Keep it under ~48 MiB so it also fits v7x's 64 MiB.
    budget = 48 * 1024 * 1024
    fixed = Hp * Hp * w_bytes + 8 * Hp * 4
    per_row = 3 * 2 * Hp * act_bytes + 4 * Hp * 4
    max_tm = max(8, (budget - fixed) // per_row)

    tm, rows_p = _choose_row_tile(rows, min(block_rows, max_tm))

    est = fixed + tm * per_row
    vmem_limit = int(min(64 * 1024 * 1024, max(int(1.25 * est), 32 * 1024 * 1024)))

    x2 = hidden_state.reshape(rows, H)
    r2 = input_tensor.reshape(rows, H)
    pad_r, pad_h = rows_p - rows, Hp - H
    if pad_r or pad_h:
        # No-op for real BERT shapes (H multiple of 128 lanes, tile divides rows);
        # only triggers for odd shapes like the tiny demo below.
        x2 = jnp.pad(x2, ((0, pad_r), (0, pad_h)))
        r2 = jnp.pad(r2, ((0, pad_r), (0, pad_h)))

    kernel = functools.partial(_bert_self_output_kernel, eps=float(eps), hidden=H)

    def _build(single_buffer_consts):
        # Constant-index blocks (W^T, bias, gamma, beta) don't need double-buffering.
        const_kw = {"pipeline_mode": pl.Buffered(1)} if single_buffer_consts else {}
        return pl.pallas_call(
            kernel,
            out_shape=jax.ShapeDtypeStruct((rows_p, Hp), out_dtype),
            grid_spec=pltpu.PrefetchScalarGridSpec(
                num_scalar_prefetch=0,
                grid=(rows_p // tm,),
                in_specs=[
                    pl.BlockSpec((tm, Hp), lambda i: (i, 0)),              # x tile
                    pl.BlockSpec((tm, Hp), lambda i: (i, 0)),              # residual tile
                    pl.BlockSpec((Hp, Hp), lambda i: (0, 0), **const_kw),  # W^T
                    pl.BlockSpec((1, Hp), lambda i: (0, 0), **const_kw),   # bias
                    pl.BlockSpec((1, Hp), lambda i: (0, 0), **const_kw),   # gamma
                    pl.BlockSpec((1, Hp), lambda i: (0, 0), **const_kw),   # beta
                ],
                out_specs=pl.BlockSpec((tm, Hp), lambda i: (i, 0)),
            ),
            compiler_params=pltpu.CompilerParams(
                dimension_semantics=("parallel",),
                vmem_limit_bytes=vmem_limit),
        )

    try:
        out = _build(True)(x2, r2, w_t, b2, gamma2, beta2)
    except Exception:
        # Fallback for JAX versions without single-buffer pipeline_mode support.
        out = _build(False)(x2, r2, w_t, b2, gamma2, beta2)

    if pad_r or pad_h:
        out = out[:rows, :H]
    return out.reshape(B, S, H)


# ----------------------------------------------------------------------------- demo
if __name__ == "__main__":
    # config: hidden_size=32, hidden_dropout_prob=0.1 (eval -> identity), eps=1e-12
    B, S, H = 2, 8, 32
    eps = 1e-12

    key = jax.random.PRNGKey(0)
    k1, k2, k3, k4 = jax.random.split(key, 4)

    hidden_state = jax.random.normal(k1, (B, S, H), dtype=jnp.float32)
    input_tensor = jax.random.normal(k2, (B, S, H), dtype=jnp.float32)

    # torch Linear layout: W is [out, in].
    bound = 1.0 / (H ** 0.5)
    w = jax.random.uniform(k3, (H, H), minval=-bound, maxval=bound, dtype=jnp.float32)
    b = jax.random.uniform(k4, (H,), minval=-bound, maxval=bound, dtype=jnp.float32)
    gamma = jnp.ones((H,), dtype=jnp.float32)
    beta = jnp.zeros((H,), dtype=jnp.float32)

    # Reference in plain JAX (f32).
    y = hidden_state @ w.T + b
    h = y + input_tensor
    mean = jnp.mean(h, axis=-1, keepdims=True)
    var = jnp.mean((h - mean) ** 2, axis=-1, keepdims=True)
    ref = (h - mean) / jnp.sqrt(var + eps) * gamma + beta

    # ---- f32 path (tight check; small block_rows to exercise a multi-step grid) ----
    params_f32 = prepare_params(w, b, gamma, beta)
    out = bert_self_output(hidden_state, input_tensor, *params_f32, eps, block_rows=8)
    out = jax.block_until_ready(out)
    assert out.shape == (B, S, H)
    assert jnp.allclose(out, ref, atol=2e-5, rtol=2e-5), "f32 mismatch vs reference"

    # ---- bf16 path (production dtype per perf review; loose check) ----
    params_bf16 = prepare_params(w, b, gamma, beta, param_dtype=jnp.bfloat16)
    out_bf16 = bert_self_output(hidden_state.astype(jnp.bfloat16),
                                input_tensor.astype(jnp.bfloat16),
                                *params_bf16, eps)
    out_bf16 = jax.block_until_ready(out_bf16)
    assert out_bf16.shape == (B, S, H) and out_bf16.dtype == jnp.bfloat16
    assert jnp.allclose(out_bf16.astype(jnp.float32), ref, atol=1e-1, rtol=1e-1), \
        "bf16 mismatch vs reference"

    print("KERNEL_OK")
</pallas_src>

<mosaic_0001>
module attributes {stable_mosaic.version = 11 : i64} {
  func.func @_bert_self_output_kernel(%arg0: i32, %arg1: memref<8x128xf32, #tpu.memory_space<vmem>>, %arg2: memref<8x128xf32, #tpu.memory_space<vmem>>, %arg3: memref<128x128xf32, #tpu.memory_space<vmem>>, %arg4: memref<1x128xf32, #tpu.memory_space<vmem>>, %arg5: memref<1x128xf32, #tpu.memory_space<vmem>>, %arg6: memref<1x128xf32, #tpu.memory_space<vmem>>, %arg7: memref<8x128xf32, #tpu.memory_space<vmem>>) attributes {dimension_semantics = [#tpu.dimension_semantics<parallel>], iteration_bounds = array<i64: 2>, scalar_prefetch = 0 : i64, scratch_operands = 0 : i64, tpu.core_type = #tpu.core_type<tc>, window_params = [{transform_indices = @transform_0, window_bounds = array<i64: 8, 128>}, {transform_indices = @transform_1, window_bounds = array<i64: 8, 128>}, {pipeline_mode = #tpu.pipeline_mode<synchronous>, transform_indices = @transform_2, window_bounds = array<i64: 128, 128>}, {pipeline_mode = #tpu.pipeline_mode<synchronous>, transform_indices = @transform_3, window_bounds = array<i64: 1, 128>}, {pipeline_mode = #tpu.pipeline_mode<synchronous>, transform_indices = @transform_4, window_bounds = array<i64: 1, 128>}, {pipeline_mode = #tpu.pipeline_mode<synchronous>, transform_indices = @transform_5, window_bounds = array<i64: 1, 128>}, {transform_indices = @transform_6, window_bounds = array<i64: 8, 128>}]} {
    %c0 = arith.constant 0 : index
    %c0_0 = arith.constant 0 : index
    %0 = vector.load %arg1[%c0, %c0_0] : memref<8x128xf32, #tpu.memory_space<vmem>>, vector<8x128xf32>
    %c0_1 = arith.constant 0 : index
    %c0_2 = arith.constant 0 : index
    %1 = vector.load %arg3[%c0_1, %c0_2] : memref<128x128xf32, #tpu.memory_space<vmem>>, vector<128x128xf32>
    %cst = arith.constant dense<0.000000e+00> : vector<8x128xf32>
    %2 = tpu.matmul %0, %1, %cst {dimension_numbers = #tpu.dot_dimension_numbers<[1], [0], [0], [1], [0, 0, 1, 1], [], []>} : vector<8x128xf32>, vector<128x128xf32>, vector<8x128xf32> -> vector<8x128xf32>
    %c0_3 = arith.constant 0 : index
    %c0_4 = arith.constant 0 : index
    %3 = vector.load %arg4[%c0_3, %c0_4] : memref<1x128xf32, #tpu.memory_space<vmem>>, vector<1x128xf32>
    %4 = vector.broadcast %3 : vector<1x128xf32> to vector<8x128xf32>
    %5 = arith.addf %2, %4 : vector<8x128xf32>
    %c0_5 = arith.constant 0 : index
    %c0_6 = arith.constant 0 : index
    %6 = vector.load %arg2[%c0_5, %c0_6] : memref<8x128xf32, #tpu.memory_space<vmem>>, vector<8x128xf32>
    %7 = arith.addf %5, %6 : vector<8x128xf32>
    %cst_7 = arith.constant dense<0.000000e+00> : vector<8xf32>
    %8 = vector.multi_reduction <add>, %7, %cst_7 [1] : vector<8x128xf32> to vector<8xf32>
    %9 = vector.shape_cast %8 : vector<8xf32> to vector<8x1xf32>
    %cst_8 = arith.constant 3.125000e-02 : f32
    %10 = vector.broadcast %cst_8 : f32 to vector<8x1xf32>
    %11 = arith.mulf %9, %10 : vector<8x1xf32>
    %12 = arith.mulf %7, %7 : vector<8x128xf32>
    %cst_9 = arith.constant dense<0.000000e+00> : vector<8xf32>
    %13 = vector.multi_reduction <add>, %12, %cst_9 [1] : vector<8x128xf32> to vector<8xf32>
    %14 = vector.shape_cast %13 : vector<8xf32> to vector<8x1xf32>
    %cst_10 = arith.constant 3.125000e-02 : f32
    %15 = vector.broadcast %cst_10 : f32 to vector<8x1xf32>
    %16 = arith.mulf %14, %15 : vector<8x1xf32>
    %17 = arith.mulf %11, %11 : vector<8x1xf32>
    %18 = arith.subf %16, %17 : vector<8x1xf32>
    %cst_11 = arith.constant 9.99999996E-13 : f32
    %19 = vector.broadcast %cst_11 : f32 to vector<8x1xf32>
    %20 = arith.addf %18, %19 : vector<8x1xf32>
    %21 = math.rsqrt %20 : vector<8x1xf32>
    %22 = vector.broadcast %11 : vector<8x1xf32> to vector<8x128xf32>
    %23 = arith.subf %7, %22 : vector<8x128xf32>
    %24 = vector.broadcast %21 : vector<8x1xf32> to vector<8x128xf32>
    %25 = arith.mulf %23, %24 : vector<8x128xf32>
    %c0_12 = arith.constant 0 : index
    %c0_13 = arith.constant 0 : index
    %26 = vector.load %arg5[%c0_12, %c0_13] : memref<1x128xf32, #tpu.memory_space<vmem>>, vector<1x128xf32>
    %27 = vector.broadcast %26 : vector<1x128xf32> to vector<8x128xf32>
    %28 = arith.mulf %25, %27 : vector<8x128xf32>
    %c0_14 = arith.constant 0 : index
    %c0_15 = arith.constant 0 : index
    %29 = vector.load %arg6[%c0_14, %c0_15] : memref<1x128xf32, #tpu.memory_space<vmem>>, vector<1x128xf32>
    %30 = vector.broadcast %29 : vector<1x128xf32> to vector<8x128xf32>
    %31 = arith.addf %28, %30 : vector<8x128xf32>
    %c0_16 = arith.constant 0 : index
    %c0_17 = arith.constant 0 : index
    %32 = vector.load %arg7[%c0_16, %c0_17] : memref<8x128xf32, #tpu.memory_space<vmem>>, vector<8x128xf32>
    tpu.vector_store %arg7[%c0_16, %c0_17], %31 {strides = array<i32>} : memref<8x128xf32, #tpu.memory_space<vmem>>, vector<8x128xf32>,
    return
  }
  func.func @transform_0(%arg0: i32) -> (i32, i32) {
    %c0_i32 = arith.constant 0 : i32
    %c0_i32_0 = arith.constant 0 : i32
    return %arg0, %c0_i32 : i32, i32
  }
  func.func @transform_1(%arg0: i32) -> (i32, i32) {
    %c0_i32 = arith.constant 0 : i32
    %c0_i32_0 = arith.constant 0 : i32
    return %arg0, %c0_i32 : i32, i32
  }
  func.func @transform_2(%arg0: i32) -> (i32, i32) {
    %c0_i32 = arith.constant 0 : i32
    %c0_i32_0 = arith.constant 0 : i32
    %c0_i32_1 = arith.constant 0 : i32
    return %c0_i32, %c0_i32_0 : i32, i32
  }
  func.func @transform_3(%arg0: i32) -> (i32, i32) {
    %c0_i32 = arith.constant 0 : i32
    %c0_i32_0 = arith.constant 0 : i32
    %c0_i32_1 = arith.constant 0 : i32
    return %c0_i32, %c0_i32_0 : i32, i32
  }
  func.func @transform_4(%arg0: i32) -> (i32, i32) {
    %c0_i32 = arith.constant 0 : i32
    %c0_i32_0 = arith.constant 0 : i32
    %c0_i32_1 = arith.constant 0 : i32
    return %c0_i32, %c0_i32_0 : i32, i32
  }
  func.func @transform_5(%arg0: i32) -> (i32, i32) {
    %c0_i32 = arith.constant 0 : i32
    %c0_i32_0 = arith.constant 0 : i32
    %c0_i32_1 = arith.constant 0 : i32
    return %c0_i32, %c0_i32_0 : i32, i32
  }
  func.func @transform_6(%arg0: i32) -> (i32, i32) {
    %c0_i32 = arith.constant 0 : i32
    %c0_i32_0 = arith.constant 0 : i32
    return %arg0, %c0_i32 : i32, i32
  }
}

module attributes {stable_mosaic.version = 11 : i64} {
  func.func @_bert_self_output_kernel(%arg0: i32, %arg1: memref<8x128xf32, #tpu.memory_space<vmem>>, %arg2: memref<8x128xf32, #tpu.memory_space<vmem>>, %arg3: memref<128x128xf32, #tpu.memory_space<vmem>>, %arg4: memref<1x128xf32, #tpu.memory_space<vmem>>, %arg5: memref<1x128xf32, #tpu.memory_space<vmem>>, %arg6: memref<1x128xf32, #tpu.memory_space<vmem>>, %arg7: memref<8x128xf32, #tpu.memory_space<vmem>>) attributes {dimension_semantics = [#tpu.dimension_semantics<parallel>], iteration_bounds = array<i64: 2>, scalar_prefetch = 0 : i64, scratch_operands = 0 : i64, tpu.core_type = #tpu.core_type<tc>, window_params = [{transform_indices = @transform_0, window_bounds = array<i64: 8, 128>}, {transform_indices = @transform_1, window_bounds = array<i64: 8, 128>}, {pipeline_mode = #tpu.pipeline_mode<synchronous>, transform_indices = @transform_2, window_bounds = array<i64: 128, 128>}, {pipeline_mode = #tpu.pipeline_mode<synchronous>, transform_indices = @transform_3, window_bounds = array<i64: 1, 128>}, {pipeline_mode = #tpu.pipeline_mode<synchronous>, transform_indices = @transform_4, window_bounds = array<i64: 1, 128>}, {pipeline_mode = #tpu.pipeline_mode<synchronous>, transform_indices = @transform_5, window_bounds = array<i64: 1, 128>}, {transform_indices = @transform_6, window_bounds = array<i64: 8, 128>}]} {
    %c0 = arith.constant 0 : index
    %c0_0 = arith.constant 0 : index
    %0 = vector.load %arg1[%c0, %c0_0] : memref<8x128xf32, #tpu.memory_space<vmem>>, vector<8x128xf32>
    %c0_1 = arith.constant 0 : index
    %c0_2 = arith.constant 0 : index
    %1 = vector.load %arg3[%c0_1, %c0_2] : memref<128x128xf32, #tpu.memory_space<vmem>>, vector<128x128xf32>
    %cst = arith.constant dense<0.000000e+00> : vector<8x128xf32>
    %2 = tpu.matmul %0, %1, %cst {dimension_numbers = #tpu.dot_dimension_numbers<[1], [0], [0], [1], [0, 0, 1, 1], [], []>} : vector<8x128xf32>, vector<128x128xf32>, vector<8x128xf32> -> vector<8x128xf32>
    %c0_3 = arith.constant 0 : index
    %c0_4 = arith.constant 0 : index
    %3 = vector.load %arg4[%c0_3, %c0_4] : memref<1x128xf32, #tpu.memory_space<vmem>>, vector<1x128xf32>
    %4 = vector.broadcast %3 : vector<1x128xf32> to vector<8x128xf32>
    %5 = arith.addf %2, %4 : vector<8x128xf32>
    %c0_5 = arith.constant 0 : index
    %c0_6 = arith.constant 0 : index
    %6 = vector.load %arg2[%c0_5, %c0_6] : memref<8x128xf32, #tpu.memory_space<vmem>>, vector<8x128xf32>
    %7 = arith.addf %5, %6 : vector<8x128xf32>
    %cst_7 = arith.constant dense<0.000000e+00> : vector<8xf32>
    %8 = vector.multi_reduction <add>, %7, %cst_7 [1] : vector<8x128xf32> to vector<8xf32>
    %9 = vector.shape_cast %8 : vector<8xf32> to vector<8x1xf32>
    %cst_8 = arith.constant 3.125000e-02 : f32
    %10 = vector.broadcast %cst_8 : f32 to vector<8x1xf32>
    %11 = arith.mulf %9, %10 : vector<8x1xf32>
    %12 = arith.mulf %7, %7 : vector<8x128xf32>
    %cst_9 = arith.constant dense<0.000000e+00> : vector<8xf32>
    %13 = vector.multi_reduction <add>, %12, %cst_9 [1] : vector<8x128xf32> to vector<8xf32>
    %14 = vector.shape_cast %13 : vector<8xf32> to vector<8x1xf32>
    %cst_10 = arith.constant 3.125000e-02 : f32
    %15 = vector.broadcast %cst_10 : f32 to vector<8x1xf32>
    %16 = arith.mulf %14, %15 : vector<8x1xf32>
    %17 = arith.mulf %11, %11 : vector<8x1xf32>
    %18 = arith.subf %16, %17 : vector<8x1xf32>
    %cst_11 = arith.constant 9.99999996E-13 : f32
    %19 = vector.broadcast %cst_11 : f32 to vector<8x1xf32>
    %20 = arith.addf %18, %19 : vector<8x1xf32>
    %21 = math.rsqrt %20 : vector<8x1xf32>
    %22 = vector.broadcast %11 : vector<8x1xf32> to vector<8x128xf32>
    %23 = arith.subf %7, %22 : vector<8x128xf32>
    %24 = vector.broadcast %21 : vector<8x1xf32> to vector<8x128xf32>
    %25 = arith.mulf %23, %24 : vector<8x128xf32>
    %c0_12 = arith.constant 0 : index
    %c0_13 = arith.constant 0 : index
    %26 = vector.load %arg5[%c0_12, %c0_13] : memref<1x128xf32, #tpu.memory_space<vmem>>, vector<1x128xf32>
    %27 = vector.broadcast %26 : vector<1x128xf32> to vector<8x128xf32>
    %28 = arith.mulf %25, %27 : vector<8x128xf32>
    %c0_14 = arith.constant 0 : index
    %c0_15 = arith.constant 0 : index
    %29 = vector.load %arg6[%c0_14, %c0_15] : memref<1x128xf32, #tpu.memory_space<vmem>>, vector<1x128xf32>
    %30 = vector.broadcast %29 : vector<1x128xf32> to vector<8x128xf32>
    %31 = arith.addf %28, %30 : vector<8x128xf32>
    %c0_16 = arith.constant 0 : index
    %c0_17 = arith.constant 0 : index
    %32 = vector.load %arg7[%c0_16, %c0_17] : memref<8x128xf32, #tpu.memory_space<vmem>>, vector<8x128xf32>
    tpu.vector_store %arg7[%c0_16, %c0_17], %31 {strides = array<i32>} : memref<8x128xf32, #tpu.memory_space<vmem>>, vector<8x128xf32>,
    return
  }
  func.func @transform_0(%arg0: i32) -> (i32, i32) {
    %c0_i32 = arith.constant 0 : i32
    %c0_i32_0 = arith.constant 0 : i32
    return %arg0, %c0_i32 : i32, i32
  }
  func.func @transform_1(%arg0: i32) -> (i32, i32) {
    %c0_i32 = arith.constant 0 : i32
    %c0_i32_0 = arith.constant 0 : i32
    return %arg0, %c0_i32 : i32, i32
  }
  func.func @transform_2(%arg0: i32) -> (i32, i32) {
    %c0_i32 = arith.constant 0 : i32
    %c0_i32_0 = arith.constant 0 : i32
    %c0_i32_1 = arith.constant 0 : i32
    return %c0_i32, %c0_i32_0 : i32, i32
  }
  func.func @transform_3(%arg0: i32) -> (i32, i32) {
    %c0_i32 = arith.constant 0 : i32
    %c0_i32_0 = arith.constant 0 : i32
    %c0_i32_1 = arith.constant 0 : i32
    return %c0_i32, %c0_i32_0 : i32, i32
  }
  func.func @transform_4(%arg0: i32) -> (i32, i32) {
    %c0_i32 = arith.constant 0 : i32
    %c0_i32_0 = arith.constant 0 : i32
    %c0_i32_1 = arith.constant 0 : i32
    return %c0_i32, %c0_i32_0 : i32, i32
  }
  func.func @transform_5(%arg0: i32) -> (i32, i32) {
    %c0_i32 = arith.constant 0 : i32
    %c0_i32_0 = arith.constant 0 : i32
    %c0_i32_1 = arith.constant 0 : i32
    return %c0_i32, %c0_i32_0 : i32, i32
  }
  func.func @transform_6(%arg0: i32) -> (i32, i32) {
    %c0_i32 = arith.constant 0 : i32
    %c0_i32_0 = arith.constant 0 : i32
    return %arg0, %c0_i32 : i32, i32
  }
}

</mosaic_0001>

<bundles_post_ra>
// kernel: tpu_custom_call.1
= control target key start
LH: loop header
LB: loop body
LE: loop exit
PB: predicated region body
PF: predicated region fallthrough
CT: control target
= control target key end

     0   :  { %s1181_s0 = inlined_call_operand.hbm [shape: f32[16,128], index: 0, kind: input, shape index: {}]   ;;  %s1182_s1 = inlined_call_operand.hbm [shape: f32[16,128], index: 1, kind: input, shape index: {}]   ;;  %s1183_s2 = inlined_call_operand.hbm [shape: f32[128,128], index: 2, kind: input, shape index: {}]   ;;  %s1184_s3 = inlined_call_operand.vmem [shape: f32[1,128], index: 3, kind: input, shape index: {}]   ;;  %s1185_s4 = inlined_call_operand.vmem [shape: f32[1,128], index: 4, kind: input, shape index: {}]   ;;  %s1186_s5 = inlined_call_operand.vmem [shape: f32[1,128], index: 5, kind: input, shape index: {}]   ;;  %s1187_s6 = inlined_call_operand.hbm [shape: f32[16,128], index: 6, kind: output, shape index: {}]  }
   0x1   :  { %1193 = sst [smem:[#allocation15_spill]] %s1183_s2 }
   0x2   :  { %11 = vsyncpa [#allocation3], 0 }
   0x3   :  { %13 = vsyncpa [#allocation3 + $0x1], 0 }
   0x4   :  { %14 = vsyncpa [#allocation6], 0 }
   0x5   :  { %16 = vsyncpa [#allocation6 + $0x1], 0 }
   0x6   :  { %17 = vsyncpa [#allocation4], 0 }
   0x7   :  { %19 = vsyncpa [#allocation4 + $0x1], 0  ;;  %s933_s21 = smov 0   ;;  %s935_s22 = smov 0  }
   0x8   :  { %s937_s23 = smov 0   ;;  %s939_s24 = smov 0  }
   0x9 LB: > { %1194 = sst [smem:[#allocation13_spill]] %s883_s23  ;;  %s954_s25 = sadd.s32 4294967295, %s887_s24   ;;  %s887_s24 = sphi %s939_s24, %s1216_s24   ;;  %s883_s23 = sphi %s937_s23, %s1215_s23   ;;  %s879_s22 = sphi %s935_s22, %s1214_s22   ;;  %s875_s21 = sphi %s933_s21, %s1213_s21  }
   0xa   : > { %s560_s26 = sadd.s32 4294967294, %s887_s24   ;;  %p45_p0 = scmp.ne.s32.totalorder %s879_s22, %s875_s21 }
   0xb   : > { %p1188_p1 = scmp.eq.s32.totalorder %s954_s25, 0  ;;  %p185_p3 = scmp.eq.s32.totalorder %s560_s26, 1 }
   0xc   : > { %p561_p5 = scmp.ge.s32.totalorder %s887_s24, 1  ;;  %p192_p7 = scmp.lt.s32.totalorder %s887_s24, 3 }
   0xd   : > { %p963_p4 = por %p1188_p1, %p45_p0  ;;  %p968_p6 = por %p185_p3, %p45_p0 }
   0xe   : > { %p973_p8 = pnand %p561_p5, %p192_p7  ;;  %s889_s30 = smov [#allocation7]  }
   0xf   : > { %s1195_s27 = scalar_select %p963_p4, 1, 0 }
  0x10   : > { %s1196_s28 = scalar_select %p968_p6, 1, 0 }
  0x11   : > { %s1197_s29 = scalar_select %p973_p8, 1, 0 }
  0x12   : > { %s204_s7 = sshll.u32 %s889_s30, 4  ;;  %p666_p9 = pneg %p973_p8  ;;  %s977_s7 = int_to_ptr.vmem [resolvable:$true] %s204_s7 }
  0x13   : > { %s989_s9 = sadd.s32 1, %s887_s24   ;;  %s32_s10 = sadd.s32 1, %s883_s23 }
  0x14   : > { %p984_p11 = pnand %p666_p9, %p1188_p1  ;;  %s29_s11 = ssub.s32 %s887_s24, %s989_s9 }
  0x15   : > { %s1199_s2 = sld [smem:[#allocation15_spill]] }
  0x16   : > { %p727_p13 = pneg %p984_p11 }
  0x1b   : > { %s725_s14 = scalar_lea.hbm %s1199_s2, 2048 }
  0x1c   : > { %p726_p12 = scmp.ne.s32.totalorder %s1199_s2, %s725_s14  ;;  %p732_p5 = scmp.lt.u32.totalorder %s725_s14, %s1199_s2 }
  0x1e   : > { %p728_p0 = pnand %p727_p13, %p726_p12 }
  0x20   : > { %p729_p3 = pneg %p728_p0 }
  0x22   : > { %p734_p7 = pnand %p732_p5, %p729_p3 }
  0x24   : > { %737 = shalt.err (!%p734_p7)
}
  0x25   : > { %s738_s19 = scalar_lea.vmem %s977_s7, 2048  ;;  %p746_p2 = scmp.lt.s32.totalorder %s977_s7, %s977_s7 }
  0x26   : > { %p739_p9 = scmp.ne.s32.totalorder %s977_s7, %s738_s19  ;;  %p747_p6 = scmp.lt.s32.totalorder %s738_s19, %s738_s19 }
  0x28   : > { %p741_p10 = pnand %p739_p9, %p727_p13  ;;  %p748_p4 = por %p747_p6, %p746_p2 }
  0x2a   : > { %p742_p1 = pneg %p741_p10 }
  0x2c   : > { %p749_p8 = pnand %p748_p4, %p742_p1 }
  0x2e   : > { %752 = shalt.err (!%p749_p8)
}
  0x2f   : > { %s890_s20 = smov 128   ;;  %s891_s26 = smov 8  }
  0x30   : > { %669 = dma.hbm_to_vmem [thread:$0]  (!%p984_p11), %s1199_s2, 2048, %s977_s7, [#allocation6], %s890_s20, %s890_s20, %s891_s26  }
  0x31   : > { %p30_p2 = scmp.eq.s32.totalorder %s29_s11, 0  ;;  %p39_p1 = scmp.ne.s32.totalorder %s883_s23, %s879_s22 }
  0x32   : > { %p40_p4 = scmp.eq.s32.totalorder %s887_s24, 0  ;;  %p682_p6 = scmp.lt.s32.totalorder %s887_s24, 2 }
  0x33   : > { %s1020_s13 = scalar_select %p30_p2, %s883_s23, %s32_s10  }
  0x34   : > { %p41_p8 = por %p40_p4, %p39_p1  ;;  %p1201_p10 = scmp.eq.s32.totalorder %s954_s25, 1 }
  0x35   : > { %1200 = sst [smem:[#allocation14_spill]] %s1020_s13  ;;  %s227_s15 = sand.u32 1, %s883_s23  }
  0x36   : > { %p1024_p12 = por %p1201_p10, %p39_p1  ;;  %s565_s16 = sshll.u32 %s887_s24, 7 }
  0x37   : > { %s1030_s17 = sshll.u32 %s227_s15, 3  ;;  %s1035_s7 = scalar_lea.hbm %s1181_s0, %s565_s16 }
  0x38   : > { %s1202_s14 = scalar_select %p1024_p12, 1, 0 }
  0x39   : > { %s231_s10 = scalar_lea.vmem [#allocation2], %s1030_s17  ;;  %p1038_p11 = pnand %p682_p6, %p41_p8 }
  0x3a   : > { %s238_s11 = sshll.u32 %s231_s10, 4  ;;  %s1047_s30 = scalar_lea.hbm %s1182_s1, %s565_s16  ;;  %s1042_s11 = int_to_ptr.vmem [resolvable:$true] %s238_s11 }
  0x3b   : > { %s228_s12 = scalar_lea.sflag [#allocation3], %s227_s15  ;;  %s753_s8 = scalar_lea.hbm %s1035_s7, 128 }
  0x3c   : > { %p754_p13 = scmp.ne.s32.totalorder %s1035_s7, %s753_s8  ;;  %p755_p0 = pneg %p1038_p11 }
  0x3d   : > { %s758_s2 = scalar_lea.hbm %s1181_s0, 256  ;;  %p759_p7 = scmp.lt.u32.totalorder %s1035_s7, %s1181_s0 }
  0x3e   : > { %p756_p3 = pnand %p755_p0, %p754_p13  ;;  %p760_p9 = scmp.lt.u32.totalorder %s758_s2, %s753_s8 }
  0x3f   : > { %p762_p1 = scmp.lt.u32.totalorder %s753_s8, %s1035_s7 }
  0x40   : > { %p757_p5 = pneg %p756_p3  ;;  %p761_p2 = por %p760_p9, %p759_p7 }
  0x42   : > { %p763_p4 = por %p762_p1, %p761_p2 }
  0x44   : > { %p764_p6 = pnand %p763_p4, %p757_p5 }
  0x46   : > { %767 = shalt.err (!%p764_p6)
}
  0x47   : > { %s768_s15 = scalar_lea.vmem %s1042_s11, 128  ;;  %s892_s16 = smov [#allocation2]  }
  0x48   : > { %p769_p8 = scmp.ne.s32.totalorder %s1042_s11, %s768_s15  ;;  %s773_s20 = sshll.u32 %s892_s16, 4  ;;  %s774_s20 = int_to_ptr.vmem [resolvable:$false] %s773_s20 }
  0x49   : > { %s775_s23 = scalar_lea.vmem %s774_s20, 256  ;;  %p776_p3 = scmp.lt.s32.totalorder %s1042_s11, %s774_s20 }
  0x4a   : > { %p771_p10 = pnand %p769_p8, %p755_p0  ;;  %p777_p7 = scmp.lt.s32.totalorder %s775_s23, %s768_s15 }
  0x4c   : > { %p772_p13 = pneg %p771_p10  ;;  %p778_p9 = por %p777_p7, %p776_p3 }
  0x4e   : > { %p779_p2 = pnand %p778_p9, %p772_p13 }
  0x50   : > { %782 = shalt.err (!%p779_p2)
}
  0x51   : > { %673 = dma.hbm_to_vmem [thread:$0]  (!%p1038_p11), %s1035_s7, 128, %s1042_s11, %s228_s12  }
  0x52   : > { %s245_s2 = sand.u32 1, %s887_s24   ;;  %s249_s13 = scalar_lea.vmem [#allocation5], %s1030_s17 }
  0x53   : > { %s256_s26 = sshll.u32 %s249_s13, 4  ;;  %s246_s8 = scalar_lea.sflag [#allocation6], %s245_s2  ;;  %s257_s26 = int_to_ptr.vmem [resolvable:$true] %s256_s26 }
  0x54   : > { %s783_s18 = scalar_lea.hbm %s1047_s30, 128  ;;  %s788_s16 = scalar_lea.hbm %s1182_s1, 256 }
  0x55   : > { %p784_p5 = scmp.ne.s32.totalorder %s1047_s30, %s783_s18  ;;  %p789_p6 = scmp.lt.u32.totalorder %s1047_s30, %s1182_s1 }
  0x56   : > { %p790_p8 = scmp.lt.u32.totalorder %s788_s16, %s783_s18  ;;  %p792_p13 = scmp.lt.u32.totalorder %s783_s18, %s1047_s30 }
  0x57   : > { %p786_p1 = pnand %p784_p5, %p755_p0 }
  0x58   : > { %p791_p10 = por %p790_p8, %p789_p6 }
  0x59   : > { %p787_p4 = pneg %p786_p1 }
  0x5a   : > { %p793_p3 = por %p792_p13, %p791_p10 }
  0x5c   : > { %p794_p7 = pnand %p793_p3, %p787_p4 }
  0x5e   : > { %797 = shalt.err (!%p794_p7)
}
  0x5f   : > { %s798_s17 = scalar_lea.vmem %s257_s26, 128  ;;  %s893_s7 = smov [#allocation5]  }
  0x60   : > { %p799_p9 = scmp.ne.s32.totalorder %s257_s26, %s798_s17  ;;  %s803_s11 = sshll.u32 %s893_s7, 4  ;;  %s804_s11 = int_to_ptr.vmem [resolvable:$false] %s803_s11 }
  0x61   : > { %s805_s12 = scalar_lea.vmem %s804_s11, 256  ;;  %p806_p1 = scmp.lt.s32.totalorder %s257_s26, %s804_s11 }
  0x62   : > { %p801_p2 = pnand %p799_p9, %p755_p0  ;;  %p807_p12 = scmp.lt.s32.totalorder %s805_s12, %s798_s17 }
  0x64   : > { %p802_p5 = pneg %p801_p2  ;;  %p808_p6 = por %p807_p12, %p806_p1 }
  0x66   : > { %p809_p8 = pnand %p808_p6, %p802_p5 }
  0x68   : > { %812 = shalt.err (!%p809_p8)
}
  0x69   : > { %676 = dma.hbm_to_vmem [thread:$0]  (!%p1038_p11), %s1047_s30, 128, %s257_s26, %s246_s8  }
  0x6a   : > { %p1204_p4 = scmp.ne.s32.totalorder %s1197_s29, 0 }
  0x6b   : > { %s1098_s2 = sand.u32 (!%p1204_p4), 1, %s879_s22   ;;  %p1205_p12 = scmp.ne.s32.totalorder (!%p1204_p4), %s1195_s27, 0 }
  0x6c   : > { %265 = sbr.rel (%p1204_p4) target bundleno = 555 (0x22b), region = 44  ;;  %s1101_s13 = sshll.u32 (!%p1204_p4), %s1098_s2, 3 }
  0x6d   : > { %s268_s18 = scalar_lea.sflag (!%p1204_p4), [#allocation3], %s1098_s2  ;;  %s271_s10 = scalar_lea.vmem (!%p1204_p4), [#allocation2], %s1101_s13 }
  0x73   : > { %858 = dma.done.wait (%p1205_p12), %s268_s18, 128  }
  0x74   : > { %860 = vsyncadd (%p1205_p12), %s268_s18, 4294967168  ;;  %s276_s29 = sand.u32 1, %s954_s25   ;;  %s280_s30 = scalar_lea.vmem [#allocation5], %s1101_s13 }
  0x75   : > { %s277_s19 = scalar_lea.sflag [#allocation6], %s276_s29 }
  0x76   : > { %862 = dma.done.wait (%p1205_p12), %s277_s19, 128  }
  0x77   : > { %864 = vsyncadd (%p1205_p12), %s277_s19, 4294967168  ;;  %p1206_p11 = scmp.eq.s32.totalorder %s954_s25, 0 }
  0x79   : > { %866 = dma.done.wait (%p1206_p11), [#allocation6], 2048   ;;  %p1207_p0 = pmov %p1206_p11 }
  0x7a   : > { %v894_v0 = vmov 0.0|0.0   ;;  %vm895_vm0 = vmmov 0   ;;  %v896_v1 = vmov 0.0   ;;  %v319_v2 = vld [vmem:[#allocation7] sm:$0xff]  ;;  %v320_v3 = vld [vmem:[#allocation7 + $0x8] sm:$0xff]  ;;  %v321_v4 = vld [vmem:[#allocation7 + $0x10] sm:$0xff] }
  0x7b   : > { %868 = vsyncadd (%p1207_p0), [#allocation6], 4294965248  ;;  %632 = vmatprep.subr.bf16.mxu0 %v894_v0  ;;  %629 = vmatprep.mubr.msk.f32.mxu0 %vm895_vm0, %v896_v1  ;;  %v633_v5 = vpack.c.bf16 %v320_v3, %v319_v2  ;;  %v322_v6 = vld [vmem:[#allocation7 + $0x18] sm:$0xff]  ;;  %v323_v8 = vld [vmem:[#allocation7 + $0x20] sm:$0xff]  ;;  %s577_s23 = sshll.u32 %s954_s25, 7  ;;  %s317_s17 = scalar_lea.vmem [#allocation8], %s1101_s13 }
  0x7c   : > { %v636_v7 = vpack.c.bf16 %v322_v6, %v321_v4  ;;  %v324_v9 = vld [vmem:[#allocation7 + $0x28] sm:$0xff]  ;;  %v325_v11 = vld [vmem:[#allocation7 + $0x30] sm:$0xff]  ;;  %v326_v12 = vld [vmem:[#allocation7 + $0x38] sm:$0xff]  ;;  %s458_s7 = sshll.u32 %s317_s17, 4  ;;  %s1137_s18 = scalar_lea.hbm %s1187_s6, %s577_s23  ;;  %s1139_s7 = int_to_ptr.vmem [resolvable:$true] %s458_s7 }
  0x7d   : > { %634 = vmatpush3.bf16.msra.mxu0 %v633_v5  ;;  %v639_v10 = vpack.c.bf16 %v324_v9, %v323_v8  ;;  %v642_v13 = vpack.c.bf16 %v326_v12, %v325_v11  ;;  %v327_v14 = vld [vmem:[#allocation7 + $0x40] sm:$0xff]  ;;  %v328_v15 = vld [vmem:[#allocation7 + $0x48] sm:$0xff]  ;;  %v329_v17 = vld [vmem:[#allocation7 + $0x50] sm:$0xff]  ;;  %s813_s29 = scalar_lea.vmem %s1139_s7, 128  ;;  %p1208_p13 = scmp.ne.s32.totalorder %s1202_s14, 0 }
  0x7e   : > { %635 = vmatprep.subr.bf16.mxu0 %v894_v0  ;;  %v645_v16 = vpack.c.bf16 %v328_v15, %v327_v14  ;;  %v330_v18 = vld [vmem:[#allocation7 + $0x58] sm:$0xff]  ;;  %v331_v20 = vld [vmem:[#allocation7 + $0x60] sm:$0xff]  ;;  %v332_v21 = vld [vmem:[#allocation7 + $0x68] sm:$0xff]  ;;  %p814_p10 = scmp.ne.s32.totalorder %s1139_s7, %s813_s29  ;;  %s897_s25 = smov [#allocation8]  }
  0x7f   : > { %v648_v19 = vpack.c.bf16 %v330_v18, %v329_v17  ;;  %v651_v22 = vpack.c.bf16 %v332_v21, %v331_v20  ;;  %v333_v23 = vld [vmem:[#allocation7 + $0x70] sm:$0xff]  ;;  %v334_v24 = vld [vmem:[#allocation7 + $0x78] sm:$0xff]  ;;  %v318_v26 = vld [vmem:[%s271_s10] sm:$0xff]  ;;  %s445_s10 = scalar_lea.sflag [#allocation4], %s1098_s2  ;;  %s817_s13 = sshll.u32 %s897_s25, 4  ;;  %s818_s13 = int_to_ptr.vmem [resolvable:$false] %s817_s13 }
  0x80   : > { %v654_v25 = vpack.c.bf16 %v334_v24, %v333_v23  ;;  %v573_v27 = vld [vmem:[%s1184_s3] ss:$0 sm:$0xff]  ;;  %v412_v29 = vld [vmem:[%s280_s30] sm:$0xff]  ;;  %p815_p3 = pnand %p814_p10, %p1208_p13  ;;  %s819_s19 = scalar_lea.vmem %s818_s13, 256 }
  0x81   : > { %637 = vmatpush3.bf16.msra.mxu0 %v636_v7  ;;  %v574_v43 = vld [vmem:[%s1185_s4] ss:$0 sm:$0xff]  ;;  %p820_p9 = scmp.lt.s32.totalorder %s1139_s7, %s818_s13  ;;  %p821_p2 = scmp.lt.s32.totalorder %s819_s19, %s813_s29 }
  0x82   : > { %638 = vmatprep.subr.bf16.mxu0 %v894_v0  ;;  %v575_v45 = vld [vmem:[%s1186_s5] ss:$0 sm:$0xff]  ;;  %p816_p7 = pneg %p815_p3 }
  0x83   : > { %p822_p5 = por %p821_p2, %p820_p9 }
  0x85   : > { %640 = vmatpush3.bf16.msra.mxu0 %v639_v10  ;;  %p823_p1 = pnand %p822_p5, %p816_p7 }
  0x86   : > { %641 = vmatprep.subr.bf16.mxu0 %v894_v0 }
  0x89   : > { %643 = vmatpush3.bf16.msra.mxu0 %v642_v13 }
  0x8a   : > { %644 = vmatprep.subr.bf16.mxu0 %v894_v0 }
  0x8d   : > { %646 = vmatpush3.bf16.msra.mxu0 %v645_v16 }
  0x8e   : > { %647 = vmatprep.subr.bf16.mxu0 %v894_v0 }
  0x91   : > { %649 = vmatpush3.bf16.msra.mxu0 %v648_v19 }
  0x92   : > { %650 = vmatprep.subr.bf16.mxu0 %v894_v0 }
  0x95   : > { %652 = vmatpush3.bf16.msra.mxu0 %v651_v22 }
  0x96   : > { %653 = vmatprep.subr.bf16.mxu0 %v894_v0 }
  0x99   : > { %655 = vmatpush3.bf16.msra.mxu0 %v654_v25 }
  0x9c   : > { %630 = vmatmul.mubr.f32.vlgmr.msra.gmra.mrb[0].mxu0 %v318_v26 }
 0x16f   : > { %v408_v28 = vpop.f32.mrb[0].mxu0 }
 0x170   : > { %v409_v30 = vadd.f32 %v573_v27, %v408_v28  ;;  %v631_v31 = vpop.f32.mrb[1].mxu0 }
 0x172   : > { %v413_v32 = vadd.f32 %v412_v29, %v409_v30 }
 0x174   : > { %414 = vadd.xlane.f32.xlu0 %v413_v32  ;;  %v417_v33 = vmul.f32 %v413_v32, %v413_v32 }
 0x178   : > { %418 = vadd.xlane.f32.xlu0 %v417_v33 }
 0x201   : > { %v415_v34 = vpop.xlane.xlu0 %414 }
 0x202   : > { %v416_v35 = vmul.f32 0.03125, %v415_v34 }
 0x204   : > { %v421_v37 = vmul.f32 %v416_v35, %v416_v35  ;;  %v425_v41 = vsub.f32 %v413_v32, %v416_v35 }
 0x205   : > { %v419_v36 = vpop.xlane.xlu0 %418 }
 0x206   : > { %v420_v38 = vmul.f32 0.03125, %v419_v36 }
 0x208   : > { %v422_v39 = vsub.f32 %v420_v38, %v421_v37 }
 0x20a   : > { %v423_v40 = vadd.f32 1e-12, %v422_v39 }
 0x20c   : > { %723 = vrsqrt.f32 %v423_v40 }
 0x216   : > { %v724_v42 = vpop.eup %723 }
 0x217   : > { %v426_v44 = vmul.f32 %v724_v42, %v425_v41 }
 0x219   : > { %v434_v46 = vmul.f32 %v574_v43, %v426_v44 }
 0x21b   : > { %v442_v47 = vadd.f32 %v575_v45, %v434_v46 }
 0x21d   : > { %443 = vst [vmem:[%s317_s17] sm:$0xff] %v442_v47 }
 0x21e   : > { %826 = shalt.err (!%p823_p1)
}
 0x21f   : > { %s827_s2 = scalar_lea.hbm %s1137_s18, 128  ;;  %s831_s26 = scalar_lea.hbm %s1187_s6, 256 }
 0x220   : > { %p828_p6 = scmp.ne.s32.totalorder %s1137_s18, %s827_s2  ;;  %p832_p12 = scmp.lt.u32.totalorder %s1137_s18, %s1187_s6 }
 0x221   : > { %p833_p11 = scmp.lt.u32.totalorder %s831_s26, %s827_s2  ;;  %p835_p10 = scmp.lt.u32.totalorder %s827_s2, %s1137_s18 }
 0x222   : > { %p829_p8 = pnand %p828_p6, %p1208_p13 }
 0x223   : > { %p834_p0 = por %p833_p11, %p832_p12 }
 0x224   : > { %p830_p4 = pneg %p829_p8 }
 0x225   : > { %p836_p3 = por %p835_p10, %p834_p0 }
 0x227   : > { %p837_p7 = pnand %p836_p3, %p830_p4 }
 0x229   : > { %840 = shalt.err (!%p837_p7)
}
 0x22a   : > { %664 = dma.vmem_to_hbm [thread:$0]  (%p1208_p13), %s1139_s7, 128, %s1137_s18, %s445_s10  }
 0x22b PF: > { %s470_s16 = sand.u32 1, %s875_s21   ;;  %p1209_p9 = scmp.ne.s32.totalorder %s1196_s28, 0 }
 0x22c   : > { %p1210_p2 = scmp.ge.s32.totalorder %s887_s24, 2  ;;  %s471_s20 = scalar_lea.sflag [#allocation4], %s470_s16 }
 0x22e   : > { %p678_p5 = pnand %p1210_p2, %p1209_p9 }
 0x230   : > { %870 = dma.done.wait (!%p678_p5), %s471_s20, 128  }
 0x231   : > { %872 = vsyncadd (!%p678_p5), %s471_s20, 4294967168  ;;  %s1211_s23 = sld [smem:[#allocation13_spill]]  ;;  %s1212_s17 = sld [smem:[#allocation14_spill]] }
 0x232   : > { %p22_p1 = scmp.ge.s32.totalorder %s989_s9, 4   ;;  %s1213_s21 = smov %s879_s22 }
 0x233   : > { %s1216_s24 = smov %s989_s9 }
 0x234   :  { %24 = sbr.rel (!%p22_p1) target bundleno = 9 (0x9), region = 106 }
 0x237   : > { %s1214_s22 = smov %s1211_s23  ;;  %s1215_s23 = smov %s1212_s17 }
 0x23b   :  { %476 = vsyncpa [#allocation3], 1 }
 0x23c   :  { %478 = vsyncpa [#allocation3 + $0x1], 1 }
 0x23d   :  { %479 = vsyncpa [#allocation6], 1 }
 0x23e   :  { %481 = vsyncpa [#allocation6 + $0x1], 1 }
 0x23f   :  { %482 = vsyncpa [#allocation4], 1 }
 0x240   :  { %484 = vsyncpa [#allocation4 + $0x1], 1 }

// kernel: tpu_custom_call.1
= control target key start
LH: loop header
LB: loop body
LE: loop exit
PB: predicated region body
PF: predicated region fallthrough
CT: control target
= control target key end

     0   :  { %s1181_s0 = inlined_call_operand.hbm [shape: f32[16,128], index: 0, kind: input, shape index: {}]   ;;  %s1182_s1 = inlined_call_operand.hbm [shape: f32[16,128], index: 1, kind: input, shape index: {}]   ;;  %s1183_s2 = inlined_call_operand.hbm [shape: f32[128,128], index: 2, kind: input, shape index: {}]   ;;  %s1184_s3 = inlined_call_operand.vmem [shape: f32[1,128], index: 3, kind: input, shape index: {}]   ;;  %s1185_s4 = inlined_call_operand.vmem [shape: f32[1,128], index: 4, kind: input, shape index: {}]   ;;  %s1186_s5 = inlined_call_operand.vmem [shape: f32[1,128], index: 5, kind: input, shape index: {}]   ;;  %s1187_s6 = inlined_call_operand.hbm [shape: f32[16,128], index: 6, kind: output, shape index: {}]  }
   0x1   :  { %1193 = sst [smem:[#allocation15_spill]] %s1183_s2 }
   0x2   :  { %11 = vsyncpa [#allocation3], 0 }
   0x3   :  { %13 = vsyncpa [#allocation3 + $0x1], 0 }
   0x4   :  { %14 = vsyncpa [#allocation6], 0 }
   0x5   :  { %16 = vsyncpa [#allocation6 + $0x1], 0 }
   0x6   :  { %17 = vsyncpa [#allocation4], 0 }
   0x7   :  { %19 = vsyncpa [#allocation4 + $0x1], 0  ;;  %s933_s21 = smov 0   ;;  %s935_s22 = smov 0  }
   0x8   :  { %s937_s23 = smov 0   ;;  %s939_s24 = smov 0  }
   0x9 LB: > { %1194 = sst [smem:[#allocation13_spill]] %s883_s23  ;;  %s954_s25 = sadd.s32 4294967295, %s887_s24   ;;  %s887_s24 = sphi %s939_s24, %s1216_s24   ;;  %s883_s23 = sphi %s937_s23, %s1215_s23   ;;  %s879_s22 = sphi %s935_s22, %s1214_s22   ;;  %s875_s21 = sphi %s933_s21, %s1213_s21  }
   0xa   : > { %s560_s26 = sadd.s32 4294967294, %s887_s24   ;;  %p45_p0 = scmp.ne.s32.totalorder %s879_s22, %s875_s21 }
   0xb   : > { %p1188_p1 = scmp.eq.s32.totalorder %s954_s25, 0  ;;  %p185_p3 = scmp.eq.s32.totalorder %s560_s26, 1 }
   0xc   : > { %p561_p5 = scmp.ge.s32.totalorder %s887_s24, 1  ;;  %p192_p7 = scmp.lt.s32.totalorder %s887_s24, 3 }
   0xd   : > { %p963_p4 = por %p1188_p1, %p45_p0  ;;  %p968_p6 = por %p185_p3, %p45_p0 }
   0xe   : > { %p973_p8 = pnand %p561_p5, %p192_p7  ;;  %s889_s30 = smov [#allocation7]  }
   0xf   : > { %s1195_s27 = scalar_select %p963_p4, 1, 0 }
  0x10   : > { %s1196_s28 = scalar_select %p968_p6, 1, 0 }
  0x11   : > { %s1197_s29 = scalar_select %p973_p8, 1, 0 }
  0x12   : > { %s204_s7 = sshll.u32 %s889_s30, 4  ;;  %p666_p9 = pneg %p973_p8  ;;  %s977_s7 = int_to_ptr.vmem [resolvable:$true] %s204_s7 }
  0x13   : > { %s989_s9 = sadd.s32 1, %s887_s24   ;;  %s32_s10 = sadd.s32 1, %s883_s23 }
  0x14   : > { %p984_p11 = pnand %p666_p9, %p1188_p1  ;;  %s29_s11 = ssub.s32 %s887_s24, %s989_s9 }
  0x15   : > { %s1199_s2 = sld [smem:[#allocation15_spill]] }
  0x16   : > { %p727_p13 = pneg %p984_p11 }
  0x1b   : > { %s725_s14 = scalar_lea.hbm %s1199_s2, 2048 }
  0x1c   : > { %p726_p12 = scmp.ne.s32.totalorder %s1199_s2, %s725_s14  ;;  %p732_p5 = scmp.lt.u32.totalorder %s725_s14, %s1199_s2 }
  0x1e   : > { %p728_p0 = pnand %p727_p13, %p726_p12 }
  0x20   : > { %p729_p3 = pneg %p728_p0 }
  0x22   : > { %p734_p7 = pnand %p732_p5, %p729_p3 }
  0x24   : > { %737 = shalt.err (!%p734_p7)
}
  0x25   : > { %s738_s19 = scalar_lea.vmem %s977_s7, 2048  ;;  %p746_p2 = scmp.lt.s32.totalorder %s977_s7, %s977_s7 }
  0x26   : > { %p739_p9 = scmp.ne.s32.totalorder %s977_s7, %s738_s19  ;;  %p747_p6 = scmp.lt.s32.totalorder %s738_s19, %s738_s19 }
  0x28   : > { %p741_p10 = pnand %p739_p9, %p727_p13  ;;  %p748_p4 = por %p747_p6, %p746_p2 }
  0x2a   : > { %p742_p1 = pneg %p741_p10 }
  0x2c   : > { %p749_p8 = pnand %p748_p4, %p742_p1 }
  0x2e   : > { %752 = shalt.err (!%p749_p8)
}
  0x2f   : > { %s890_s20 = smov 128   ;;  %s891_s26 = smov 8  }
  0x30   : > { %669 = dma.hbm_to_vmem [thread:$0]  (!%p984_p11), %s1199_s2, 2048, %s977_s7, [#allocation6], %s890_s20, %s890_s20, %s891_s26  }
  0x31   : > { %p30_p2 = scmp.eq.s32.totalorder %s29_s11, 0  ;;  %p39_p1 = scmp.ne.s32.totalorder %s883_s23, %s879_s22 }
  0x32   : > { %p40_p4 = scmp.eq.s32.totalorder %s887_s24, 0  ;;  %p682_p6 = scmp.lt.s32.totalorder %s887_s24, 2 }
  0x33   : > { %s1020_s13 = scalar_select %p30_p2, %s883_s23, %s32_s10  }
  0x34   : > { %p41_p8 = por %p40_p4, %p39_p1  ;;  %p1201_p10 = scmp.eq.s32.totalorder %s954_s25, 1 }
  0x35   : > { %1200 = sst [smem:[#allocation14_spill]] %s1020_s13  ;;  %s227_s15 = sand.u32 1, %s883_s23  }
  0x36   : > { %p1024_p12 = por %p1201_p10, %p39_p1  ;;  %s565_s16 = sshll.u32 %s887_s24, 7 }
  0x37   : > { %s1030_s17 = sshll.u32 %s227_s15, 3  ;;  %s1035_s7 = scalar_lea.hbm %s1181_s0, %s565_s16 }
  0x38   : > { %s1202_s14 = scalar_select %p1024_p12, 1, 0 }
  0x39   : > { %s231_s10 = scalar_lea.vmem [#allocation2], %s1030_s17  ;;  %p1038_p11 = pnand %p682_p6, %p41_p8 }
  0x3a   : > { %s238_s11 = sshll.u32 %s231_s10, 4  ;;  %s1047_s30 = scalar_lea.hbm %s1182_s1, %s565_s16  ;;  %s1042_s11 = int_to_ptr.vmem [resolvable:$true] %s238_s11 }
  0x3b   : > { %s228_s12 = scalar_lea.sflag [#allocation3], %s227_s15  ;;  %s753_s8 = scalar_lea.hbm %s1035_s7, 128 }
  0x3c   : > { %p754_p13 = scmp.ne.s32.totalorder %s1035_s7, %s753_s8  ;;  %p755_p0 = pneg %p1038_p11 }
  0x3d   : > { %s758_s2 = scalar_lea.hbm %s1181_s0, 256  ;;  %p759_p7 = scmp.lt.u32.totalorder %s1035_s7, %s1181_s0 }
  0x3e   : > { %p756_p3 = pnand %p755_p0, %p754_p13  ;;  %p760_p9 = scmp.lt.u32.totalorder %s758_s2, %s753_s8 }
  0x3f   : > { %p762_p1 = scmp.lt.u32.totalorder %s753_s8, %s1035_s7 }
  0x40   : > { %p757_p5 = pneg %p756_p3  ;;  %p761_p2 = por %p760_p9, %p759_p7 }
  0x42   : > { %p763_p4 = por %p762_p1, %p761_p2 }
  0x44   : > { %p764_p6 = pnand %p763_p4, %p757_p5 }
  0x46   : > { %767 = shalt.err (!%p764_p6)
}
  0x47   : > { %s768_s15 = scalar_lea.vmem %s1042_s11, 128  ;;  %s892_s16 = smov [#allocation2]  }
  0x48   : > { %p769_p8 = scmp.ne.s32.totalorder %s1042_s11, %s768_s15  ;;  %s773_s20 = sshll.u32 %s892_s16, 4  ;;  %s774_s20 = int_to_ptr.vmem [resolvable:$false] %s773_s20 }
  0x49   : > { %s775_s23 = scalar_lea.vmem %s774_s20, 256  ;;  %p776_p3 = scmp.lt.s32.totalorder %s1042_s11, %s774_s20 }
  0x4a   : > { %p771_p10 = pnand %p769_p8, %p755_p0  ;;  %p777_p7 = scmp.lt.s32.totalorder %s775_s23, %s768_s15 }
  0x4c   : > { %p772_p13 = pneg %p771_p10  ;;  %p778_p9 = por %p777_p7, %p776_p3 }
  0x4e   : > { %p779_p2 = pnand %p778_p9, %p772_p13 }
  0x50   : > { %782 = shalt.err (!%p779_p2)
}
  0x51   : > { %673 = dma.hbm_to_vmem [thread:$0]  (!%p1038_p11), %s1035_s7, 128, %s1042_s11, %s228_s12  }
  0x52   : > { %s245_s2 = sand.u32 1, %s887_s24   ;;  %s249_s13 = scalar_lea.vmem [#allocation5], %s1030_s17 }
  0x53   : > { %s256_s26 = sshll.u32 %s249_s13, 4  ;;  %s246_s8 = scalar_lea.sflag [#allocation6], %s245_s2  ;;  %s257_s26 = int_to_ptr.vmem [resolvable:$true] %s256_s26 }
  0x54   : > { %s783_s18 = scalar_lea.hbm %s1047_s30, 128  ;;  %s788_s16 = scalar_lea.hbm %s1182_s1, 256 }
  0x55   : > { %p784_p5 = scmp.ne.s32.totalorder %s1047_s30, %s783_s18  ;;  %p789_p6 = scmp.lt.u32.totalorder %s1047_s30, %s1182_s1 }
  0x56   : > { %p790_p8 = scmp.lt.u32.totalorder %s788_s16, %s783_s18  ;;  %p792_p13 = scmp.lt.u32.totalorder %s783_s18, %s1047_s30 }
  0x57   : > { %p786_p1 = pnand %p784_p5, %p755_p0 }
  0x58   : > { %p791_p10 = por %p790_p8, %p789_p6 }
  0x59   : > { %p787_p4 = pneg %p786_p1 }
  0x5a   : > { %p793_p3 = por %p792_p13, %p791_p10 }
  0x5c   : > { %p794_p7 = pnand %p793_p3, %p787_p4 }
  0x5e   : > { %797 = shalt.err (!%p794_p7)
}
  0x5f   : > { %s798_s17 = scalar_lea.vmem %s257_s26, 128  ;;  %s893_s7 = smov [#allocation5]  }
  0x60   : > { %p799_p9 = scmp.ne.s32.totalorder %s257_s26, %s798_s17  ;;  %s803_s11 = sshll.u32 %s893_s7, 4  ;;  %s804_s11 = int_to_ptr.vmem [resolvable:$false] %s803_s11 }
  0x61   : > { %s805_s12 = scalar_lea.vmem %s804_s11, 256  ;;  %p806_p1 = scmp.lt.s32.totalorder %s257_s26, %s804_s11 }
  0x62   : > { %p801_p2 = pnand %p799_p9, %p755_p0  ;;  %p807_p12 = scmp.lt.s32.totalorder %s805_s12, %s798_s17 }
  0x64   : > { %p802_p5 = pneg %p801_p2  ;;  %p808_p6 = por %p807_p12, %p806_p1 }
  0x66   : > { %p809_p8 = pnand %p808_p6, %p802_p5 }
  0x68   : > { %812 = shalt.err (!%p809_p8)
}
  0x69   : > { %676 = dma.hbm_to_vmem [thread:$0]  (!%p1038_p11), %s1047_s30, 128, %s257_s26, %s246_s8  }
  0x6a   : > { %p1204_p4 = scmp.ne.s32.totalorder %s1197_s29, 0 }
  0x6b   : > { %s1098_s2 = sand.u32 (!%p1204_p4), 1, %s879_s22   ;;  %p1205_p12 = scmp.ne.s32.totalorder (!%p1204_p4), %s1195_s27, 0 }
  0x6c   : > { %265 = sbr.rel (%p1204_p4) target bundleno = 555 (0x22b), region = 44  ;;  %s1101_s13 = sshll.u32 (!%p1204_p4), %s1098_s2, 3 }
  0x6d   : > { %s268_s18 = scalar_lea.sflag (!%p1204_p4), [#allocation3], %s1098_s2  ;;  %s271_s10 = scalar_lea.vmem (!%p1204_p4), [#allocation2], %s1101_s13 }
  0x73   : > { %858 = dma.done.wait (%p1205_p12), %s268_s18, 128  }
  0x74   : > { %860 = vsyncadd (%p1205_p12), %s268_s18, 4294967168  ;;  %s276_s29 = sand.u32 1, %s954_s25   ;;  %s280_s30 = scalar_lea.vmem [#allocation5], %s1101_s13 }
  0x75   : > { %s277_s19 = scalar_lea.sflag [#allocation6], %s276_s29 }
  0x76   : > { %862 = dma.done.wait (%p1205_p12), %s277_s19, 128  }
  0x77   : > { %864 = vsyncadd (%p1205_p12), %s277_s19, 4294967168  ;;  %p1206_p11 = scmp.eq.s32.totalorder %s954_s25, 0 }
  0x79   : > { %866 = dma.done.wait (%p1206_p11), [#allocation6], 2048   ;;  %p1207_p0 = pmov %p1206_p11 }
  0x7a   : > { %v894_v0 = vmov 0.0|0.0   ;;  %vm895_vm0 = vmmov 0   ;;  %v896_v1 = vmov 0.0   ;;  %v319_v2 = vld [vmem:[#allocation7] sm:$0xff]  ;;  %v320_v3 = vld [vmem:[#allocation7 + $0x8] sm:$0xff]  ;;  %v321_v4 = vld [vmem:[#allocation7 + $0x10] sm:$0xff] }
  0x7b   : > { %868 = vsyncadd (%p1207_p0), [#allocation6], 4294965248  ;;  %632 = vmatprep.subr.bf16.mxu0 %v894_v0  ;;  %629 = vmatprep.mubr.msk.f32.mxu0 %vm895_vm0, %v896_v1  ;;  %v633_v5 = vpack.c.bf16 %v320_v3, %v319_v2  ;;  %v322_v6 = vld [vmem:[#allocation7 + $0x18] sm:$0xff]  ;;  %v323_v8 = vld [vmem:[#allocation7 + $0x20] sm:$0xff]  ;;  %s577_s23 = sshll.u32 %s954_s25, 7  ;;  %s317_s17 = scalar_lea.vmem [#allocation8], %s1101_s13 }
  0x7c   : > { %v636_v7 = vpack.c.bf16 %v322_v6, %v321_v4  ;;  %v324_v9 = vld [vmem:[#allocation7 + $0x28] sm:$0xff]  ;;  %v325_v11 = vld [vmem:[#allocation7 + $0x30] sm:$0xff]  ;;  %v326_v12 = vld [vmem:[#allocation7 + $0x38] sm:$0xff]  ;;  %s458_s7 = sshll.u32 %s317_s17, 4  ;;  %s1137_s18 = scalar_lea.hbm %s1187_s6, %s577_s23  ;;  %s1139_s7 = int_to_ptr.vmem [resolvable:$true] %s458_s7 }
  0x7d   : > { %634 = vmatpush3.bf16.msra.mxu0 %v633_v5  ;;  %v639_v10 = vpack.c.bf16 %v324_v9, %v323_v8  ;;  %v642_v13 = vpack.c.bf16 %v326_v12, %v325_v11  ;;  %v327_v14 = vld [vmem:[#allocation7 + $0x40] sm:$0xff]  ;;  %v328_v15 = vld [vmem:[#allocation7 + $0x48] sm:$0xff]  ;;  %v329_v17 = vld [vmem:[#allocation7 + $0x50] sm:$0xff]  ;;  %s813_s29 = scalar_lea.vmem %s1139_s7, 128  ;;  %p1208_p13 = scmp.ne.s32.totalorder %s1202_s14, 0 }
  0x7e   : > { %635 = vmatprep.subr.bf16.mxu0 %v894_v0  ;;  %v645_v16 = vpack.c.bf16 %v328_v15, %v327_v14  ;;  %v330_v18 = vld [vmem:[#allocation7 + $0x58] sm:$0xff]  ;;  %v331_v20 = vld [vmem:[#allocation7 + $0x60] sm:$0xff]  ;;  %v332_v21 = vld [vmem:[#allocation7 + $0x68] sm:$0xff]  ;;  %p814_p10 = scmp.ne.s32.totalorder %s1139_s7, %s813_s29  ;;  %s897_s25 = smov [#allocation8]  }
  0x7f   : > { %v648_v19 = vpack.c.bf16 %v330_v18, %v329_v17  ;;  %v651_v22 = vpack.c.bf16 %v332_v21, %v331_v20  ;;  %v333_v23 = vld [vmem:[#allocation7 + $0x70] sm:$0xff]  ;;  %v334_v24 = vld [vmem:[#allocation7 + $0x78] sm:$0xff]  ;;  %v318_v26 = vld [vmem:[%s271_s10] sm:$0xff]  ;;  %s445_s10 = scalar_lea.sflag [#allocation4], %s1098_s2  ;;  %s817_s13 = sshll.u32 %s897_s25, 4  ;;  %s818_s13 = int_to_ptr.vmem [resolvable:$false] %s817_s13 }
  0x80   : > { %v654_v25 = vpack.c.bf16 %v334_v24, %v333_v23  ;;  %v573_v27 = vld [vmem:[%s1184_s3] ss:$0 sm:$0xff]  ;;  %v412_v29 = vld [vmem:[%s280_s30] sm:$0xff]  ;;  %p815_p3 = pnand %p814_p10, %p1208_p13  ;;  %s819_s19 = scalar_lea.vmem %s818_s13, 256 }
  0x81   : > { %637 = vmatpush3.bf16.msra.mxu0 %v636_v7  ;;  %v574_v43 = vld [vmem:[%s1185_s4] ss:$0 sm:$0xff]  ;;  %p820_p9 = scmp.lt.s32.totalorder %s1139_s7, %s818_s13  ;;  %p821_p2 = scmp.lt.s32.totalorder %s819_s19, %s813_s29 }
  0x82   : > { %638 = vmatprep.subr.bf16.mxu0 %v894_v0  ;;  %v575_v45 = vld [vmem:[%s1186_s5] ss:$0 sm:$0xff]  ;;  %p816_p7 = pneg %p815_p3 }
  0x83   : > { %p822_p5 = por %p821_p2, %p820_p9 }
  0x85   : > { %640 = vmatpush3.bf16.msra.mxu0 %v639_v10  ;;  %p823_p1 = pnand %p822_p5, %p816_p7 }
  0x86   : > { %641 = vmatprep.subr.bf16.mxu0 %v894_v0 }
  0x89   : > { %643 = vmatpush3.bf16.msra.mxu0 %v642_v13 }
  0x8a   : > { %644 = vmatprep.subr.bf16.mxu0 %v894_v0 }
  0x8d   : > { %646 = vmatpush3.bf16.msra.mxu0 %v645_v16 }
  0x8e   : > { %647 = vmatprep.subr.bf16.mxu0 %v894_v0 }
  0x91   : > { %649 = vmatpush3.bf16.msra.mxu0 %v648_v19 }
  0x92   : > { %650 = vmatprep.subr.bf16.mxu0 %v894_v0 }
  0x95   : > { %652 = vmatpush3.bf16.msra.mxu0 %v651_v22 }
  0x96   : > { %653 = vmatprep.subr.bf16.mxu0 %v894_v0 }
  0x99   : > { %655 = vmatpush3.bf16.msra.mxu0 %v654_v25 }
  0x9c   : > { %630 = vmatmul.mubr.f32.vlgmr.msra.gmra.mrb[0].mxu0 %v318_v26 }
 0x16f   : > { %v408_v28 = vpop.f32.mrb[0].mxu0 }
 0x170   : > { %v409_v30 = vadd.f32 %v573_v27, %v408_v28  ;;  %v631_v31 = vpop.f32.mrb[1].mxu0 }
 0x172   : > { %v413_v32 = vadd.f32 %v412_v29, %v409_v30 }
 0x174   : > { %414 = vadd.xlane.f32.xlu0 %v413_v32  ;;  %v417_v33 = vmul.f32 %v413_v32, %v413_v32 }
 0x178   : > { %418 = vadd.xlane.f32.xlu0 %v417_v33 }
 0x201   : > { %v415_v34 = vpop.xlane.xlu0 %414 }
 0x202   : > { %v416_v35 = vmul.f32 0.03125, %v415_v34 }
 0x204   : > { %v421_v37 = vmul.f32 %v416_v35, %v416_v35  ;;  %v425_v41 = vsub.f32 %v413_v32, %v416_v35 }
 0x205   : > { %v419_v36 = vpop.xlane.xlu0 %418 }
 0x206   : > { %v420_v38 = vmul.f32 0.03125, %v419_v36 }
 0x208   : > { %v422_v39 = vsub.f32 %v420_v38, %v421_v37 }
 0x20a   : > { %v423_v40 = vadd.f32 1e-12, %v422_v39 }
 0x20c   : > { %723 = vrsqrt.f32 %v423_v40 }
 0x216   : > { %v724_v42 = vpop.eup %723 }
 0x217   : > { %v426_v44 = vmul.f32 %v724_v42, %v425_v41 }
 0x219   : > { %v434_v46 = vmul.f32 %v574_v43, %v426_v44 }
 0x21b   : > { %v442_v47 = vadd.f32 %v575_v45, %v434_v46 }
 0x21d   : > { %443 = vst [vmem:[%s317_s17] sm:$0xff] %v442_v47 }
 0x21e   : > { %826 = shalt.err (!%p823_p1)
}
 0x21f   : > { %s827_s2 = scalar_lea.hbm %s1137_s18, 128  ;;  %s831_s26 = scalar_lea.hbm %s1187_s6, 256 }
 0x220   : > { %p828_p6 = scmp.ne.s32.totalorder %s1137_s18, %s827_s2  ;;  %p832_p12 = scmp.lt.u32.totalorder %s1137_s18, %s1187_s6 }
 0x221   : > { %p833_p11 = scmp.lt.u32.totalorder %s831_s26, %s827_s2  ;;  %p835_p10 = scmp.lt.u32.totalorder %s827_s2, %s1137_s18 }
 0x222   : > { %p829_p8 = pnand %p828_p6, %p1208_p13 }
 0x223   : > { %p834_p0 = por %p833_p11, %p832_p12 }
 0x224   : > { %p830_p4 = pneg %p829_p8 }
 0x225   : > { %p836_p3 = por %p835_p10, %p834_p0 }
 0x227   : > { %p837_p7 = pnand %p836_p3, %p830_p4 }
 0x229   : > { %840 = shalt.err (!%p837_p7)
}
 0x22a   : > { %664 = dma.vmem_to_hbm [thread:$0]  (%p1208_p13), %s1139_s7, 128, %s1137_s18, %s445_s10  }
 0x22b PF: > { %s470_s16 = sand.u32 1, %s875_s21   ;;  %p1209_p9 = scmp.ne.s32.totalorder %s1196_s28, 0 }
 0x22c   : > { %p1210_p2 = scmp.ge.s32.totalorder %s887_s24, 2  ;;  %s471_s20 = scalar_lea.sflag [#allocation4], %s470_s16 }
 0x22e   : > { %p678_p5 = pnand %p1210_p2, %p1209_p9 }
 0x230   : > { %870 = dma.done.wait (!%p678_p5), %s471_s20, 128  }
 0x231   : > { %872 = vsyncadd (!%p678_p5), %s471_s20, 4294967168  ;;  %s1211_s23 = sld [smem:[#allocation13_spill]]  ;;  %s1212_s17 = sld [smem:[#allocation14_spill]] }
 0x232   : > { %p22_p1 = scmp.ge.s32.totalorder %s989_s9, 4   ;;  %s1213_s21 = smov %s879_s22 }
 0x233   : > { %s1216_s24 = smov %s989_s9 }
 0x234   :  { %24 = sbr.rel (!%p22_p1) target bundleno = 9 (0x9), region = 106 }
 0x237   : > { %s1214_s22 = smov %s1211_s23  ;;  %s1215_s23 = smov %s1212_s17 }
 0x23b   :  { %476 = vsyncpa [#allocation3], 1 }
 0x23c   :  { %478 = vsyncpa [#allocation3 + $0x1], 1 }
 0x23d   :  { %479 = vsyncpa [#allocation6], 1 }
 0x23e   :  { %481 = vsyncpa [#allocation6 + $0x1], 1 }
 0x23f   :  { %482 = vsyncpa [#allocation4], 1 }
 0x240   :  { %484 = vsyncpa [#allocation4 + $0x1], 1 }

</bundles_post_ra>
